<compile_context>
chip_gen: v5e
topology: v5e:2x2
jax: 0.10.0
libtpu: 0.0.40
codegen_flags: <defaults>
</compile_context>

<pallas_src>
import functools
import math

import jax
import jax.numpy as jnp
from jax.experimental import pallas as pl
from jax.experimental.pallas import tpu as pltpu

_VMEM_LIMIT_BYTES = 48 * 1024 * 1024   # scoped VMEM request (safe on v5e/v6e/v7x)
_TILE_VMEM_BUDGET = 24 * 1024 * 1024   # budget for double-buffered x-in + out blocks
_MAX_LANE_TILE = 8192                  # cap on the spatial (lane) tile


def _fc_scale(mean_col, w1t_ref, b1_ref, w2_ref, b2_ref):
    """Tiny excitation MLP on the pooled (C, 1) vector, done on the VPU/XLU.

    fc1: h[j] = sum_c w1[j, c] * mean[c] + b1[j]   (sublane reduce -> (1, H))
    fc2: z[c] = sum_j w2[c, j] * h[j]    + b2[c]   (lane reduce    -> (C, 1))
    Avoids masked column-vector MXU matmuls entirely.
    """
    h = jnp.sum(w1t_ref[...] * mean_col, axis=0, keepdims=True) + b1_ref[...]   # (1, H)
    h = h * jax.nn.sigmoid(h)                                                   # swish
    z = jnp.sum(w2_ref[...] * h, axis=-1, keepdims=True) + b2_ref[...]          # (C, 1)
    return jax.nn.sigmoid(z)                                                    # (C, 1)


def _se_fused_kernel(x_ref, w1t_ref, b1_ref, w2_ref, b2_ref, o_ref, *, inv_s):
    # Fast path: the whole (C, S) slab of one batch element fits in VMEM.
    x = x_ref[0]                                                            # (C, S), native dtype
    mean = jnp.sum(x, axis=-1, keepdims=True, dtype=jnp.float32) * inv_s    # (C, 1) f32 accumulation
    scale = _fc_scale(mean, w1t_ref, b1_ref, w2_ref, b2_ref)                # (C, 1) f32
    # Multiply in x's native dtype (no full-tile f32 copy of x).
    o_ref[0] = x * scale.astype(o_ref.dtype)


def _se_reduce_kernel(x_ref, w1t_ref, b1_ref, w2_ref, b2_ref, scale_ref, acc_ref,
                      *, inv_s, ts, s_total, masked):
    # Pass 1: S-tiled sum with an f32 accumulator; finalize the FC on the last S tile.
    s = pl.program_id(1)

    @pl.when(s == 0)
    def _():
        acc_ref[...] = jnp.zeros_like(acc_ref)

    x = x_ref[0]                                                  # (C, TS), native dtype
    if masked:  # static flag: only emitted when TS does not divide S (ragged tail tile)
        col = jax.lax.broadcasted_iota(jnp.int32, x.shape, 1) + s * ts
        x = jnp.where(col < s_total, x, jnp.zeros_like(x))
    acc_ref[...] += jnp.sum(x, axis=-1, keepdims=True, dtype=jnp.float32)

    @pl.when(s == pl.num_programs(1) - 1)
    def _():
        mean = acc_ref[...] * inv_s                               # (C, 1) f32
        scale_ref[0] = _fc_scale(mean, w1t_ref, b1_ref, w2_ref, b2_ref)


def _se_scale_kernel(x_ref, scale_ref, o_ref):
    # Pass 2: elementwise x * scale, native dtype, fully parallel grid.
    # TODO(synk): on v5e (no bf16 VPU) a bf16 input could be routed through f32 math instead.
    o_ref[...] = x_ref[...] * scale_ref[...].astype(o_ref.dtype)


def squeeze_excitation(x, w1, b1, w2, b2, *,
                       max_lane_tile=_MAX_LANE_TILE,
                       force_two_pass=False):
    """SqueezeExcitation forward. x: (B, C, *spatial); w1:(H,C), b1:(H,), w2:(C,H), b2:(C,)."""
    B, C = x.shape[:2]
    S = int(math.prod(x.shape[2:]))
    H = w1.shape[0]
    x_flat = x.reshape(B, C, S)
    itemsize = jnp.dtype(x.dtype).itemsize
    inv_s = 1.0 / float(S)

    # Excitation weights, pre-laid-out (all tiny) for the VPU FC path.
    w1t = jnp.asarray(w1, jnp.float32).T               # (C, H)
    b1r = jnp.asarray(b1, jnp.float32).reshape(1, H)   # (1, H)
    w2f = jnp.asarray(w2, jnp.float32)                 # (C, H)
    b2c = jnp.asarray(b2, jnp.float32).reshape(C, 1)   # (C, 1)

    # ---------- fast path: whole spatial volume per batch element fits VMEM ----------
    fused_bytes = 4 * C * S * itemsize        # double-buffered input + output block
    if (not force_two_pass) and fused_bytes <= _TILE_VMEM_BUDGET:
        out = pl.pallas_call(
            functools.partial(_se_fused_kernel, inv_s=inv_s),
            out_shape=jax.ShapeDtypeStruct((B, C, S), x.dtype),
            grid_spec=pltpu.PrefetchScalarGridSpec(
                num_scalar_prefetch=0,
                grid=(B,),
                in_specs=[
                    pl.BlockSpec((1, C, S), lambda b: (b, 0, 0)),
                    pl.BlockSpec((C, H), lambda b: (0, 0)),
                    pl.BlockSpec((1, H), lambda b: (0, 0)),
                    pl.BlockSpec((C, H), lambda b: (0, 0)),
                    pl.BlockSpec((C, 1), lambda b: (0, 0)),
                ],
                out_specs=pl.BlockSpec((1, C, S), lambda b: (b, 0, 0)),
            ),
            compiler_params=pltpu.CompilerParams(
                dimension_semantics=("parallel",),
                vmem_limit_bytes=_VMEM_LIMIT_BYTES),
        )(x_flat, w1t, b1r, w2f, b2c)
        return out.reshape(x.shape)

    # ---------- two-pass, S-tiled path (production-size volumes) ----------
    ts = min(S, max_lane_tile, _TILE_VMEM_BUDGET // (4 * C * itemsize))
    if ts >= S:
        ts = S                                  # one tile covers the full spatial extent
    else:
        ts = max(128, (ts // 128) * 128)        # lane-aligned tile
    n_s = -(-S // ts)
    masked = (S % ts) != 0

    # Pass 1: tiled global-average-pool + excitation MLP -> (B, C, 1) f32 scale.
    scale = pl.pallas_call(
        functools.partial(_se_reduce_kernel, inv_s=inv_s, ts=ts, s_total=S, masked=masked),
        out_shape=jax.ShapeDtypeStruct((B, C, 1), jnp.float32),
        grid_spec=pltpu.PrefetchScalarGridSpec(
            num_scalar_prefetch=0,
            grid=(B, n_s),
            in_specs=[
                pl.BlockSpec((1, C, ts), lambda b, s: (b, 0, s)),
                pl.BlockSpec((C, H), lambda b, s: (0, 0)),
                pl.BlockSpec((1, H), lambda b, s: (0, 0)),
                pl.BlockSpec((C, H), lambda b, s: (0, 0)),
                pl.BlockSpec((C, 1), lambda b, s: (0, 0)),
            ],
            out_specs=pl.BlockSpec((1, C, 1), lambda b, s: (b, 0, 0)),
            scratch_shapes=[pltpu.VMEM((C, 1), jnp.float32)],
        ),
        compiler_params=pltpu.CompilerParams(
            dimension_semantics=("parallel", "arbitrary"),
            vmem_limit_bytes=_VMEM_LIMIT_BYTES),
    )(x_flat, w1t, b1r, w2f, b2c)

    # Pass 2: S-tiled, fully parallel x * scale in native dtype.
    out = pl.pallas_call(
        _se_scale_kernel,
        out_shape=jax.ShapeDtypeStruct((B, C, S), x.dtype),
        grid_spec=pltpu.PrefetchScalarGridSpec(
            num_scalar_prefetch=0,
            grid=(B, n_s),
            in_specs=[
                pl.BlockSpec((1, C, ts), lambda b, s: (b, 0, s)),
                pl.BlockSpec((1, C, 1), lambda b, s: (b, 0, 0)),
            ],
            out_specs=pl.BlockSpec((1, C, ts), lambda b, s: (b, 0, s)),
        ),
        compiler_params=pltpu.CompilerParams(
            dimension_semantics=("parallel", "parallel"),
            vmem_limit_bytes=_VMEM_LIMIT_BYTES),
    )(x_flat, scale)
    return out.reshape(x.shape)


def _se_reference(x, w1, b1, w2, b2):
    B, C = x.shape[:2]
    y = jnp.mean(x.reshape(B, C, -1), axis=-1)            # (B, C)
    h = y @ w1.T + b1
    h = h * jax.nn.sigmoid(h)
    z = h @ w2.T + b2
    s = jax.nn.sigmoid(z).reshape((B, C) + (1,) * (x.ndim - 2))
    return x * s


if __name__ == "__main__":
    key = jax.random.PRNGKey(0)
    # SqueezeExcitation(channels=32, reduction=16, type='3D')
    B, C, D, Hs, Ws = 2, 32, 8, 8, 8
    reduction = 16
    Hid = C // reduction

    k_x, k_w1, k_b1, k_w2, k_b2, k_x2 = jax.random.split(key, 6)
    x3d = jax.random.normal(k_x, (B, C, D, Hs, Ws), dtype=jnp.float32)
    # nn.Linear(channels, channels // reduction) -> weight (Hid, C), bias (Hid,)
    w1 = jax.random.normal(k_w1, (Hid, C), dtype=jnp.float32) * 0.1
    b1 = jax.random.normal(k_b1, (Hid,), dtype=jnp.float32) * 0.1
    # nn.Linear(channels // reduction, channels) -> weight (C, Hid), bias (C,)
    w2 = jax.random.normal(k_w2, (C, Hid), dtype=jnp.float32) * 0.1
    b2 = jax.random.normal(k_b2, (C,), dtype=jnp.float32) * 0.1

    ref3d = _se_reference(x3d, w1, b1, w2, b2)

    # 1) fused single-block fast path (whole volume fits the VMEM budget)
    out = jax.block_until_ready(squeeze_excitation(x3d, w1, b1, w2, b2))
    assert out.shape == x3d.shape
    assert jnp.allclose(out, ref3d, atol=1e-5, rtol=1e-5), "fused path mismatch"

    # 2) two-pass S-tiled path (forced; 128-lane tiles -> 4 spatial tiles)
    out = jax.block_until_ready(
        squeeze_excitation(x3d, w1, b1, w2, b2, force_two_pass=True, max_lane_tile=128))
    assert jnp.allclose(out, ref3d, atol=1e-5, rtol=1e-5), "two-pass path mismatch"

    # 3) two-pass path with a ragged spatial extent (2D SE: S = 400, masked tail tile)
    x2d = jax.random.normal(k_x2, (1, C, 20, 20), dtype=jnp.float32)
    ref2d = _se_reference(x2d, w1, b1, w2, b2)
    out2 = jax.block_until_ready(
        squeeze_excitation(x2d, w1, b1, w2, b2, force_two_pass=True, max_lane_tile=128))
    assert jnp.allclose(out2, ref2d, atol=1e-5, rtol=1e-5), "ragged two-pass mismatch"

    # 4) bf16 input through the fused path (multiply kept in native dtype, f32 accumulation)
    xbf = x3d.astype(jnp.bfloat16)
    outbf = jax.block_until_ready(squeeze_excitation(xbf, w1, b1, w2, b2))
    refbf = _se_reference(xbf.astype(jnp.float32), w1, b1, w2, b2)
    assert jnp.allclose(outbf.astype(jnp.float32), refbf, atol=5e-2, rtol=5e-2), "bf16 mismatch"

    print("KERNEL_OK")
</pallas_src>

<mosaic_0001>
module attributes {stable_mosaic.version = 11 : i64} {
  func.func @_se_fused_kernel(%arg0: i32, %arg1: memref<1x32x512xf32, #tpu.memory_space<vmem>>, %arg2: memref<32x2xf32, #tpu.memory_space<vmem>>, %arg3: memref<1x2xf32, #tpu.memory_space<vmem>>, %arg4: memref<32x2xf32, #tpu.memory_space<vmem>>, %arg5: memref<32x1xf32, #tpu.memory_space<vmem>>, %arg6: memref<1x32x512xf32, #tpu.memory_space<vmem>>) attributes {dimension_semantics = [#tpu.dimension_semantics<parallel>], iteration_bounds = array<i64: 2>, scalar_prefetch = 0 : i64, scratch_operands = 0 : i64, tpu.core_type = #tpu.core_type<tc>, window_params = [{transform_indices = @transform_0, window_bounds = array<i64: 1, 32, 512>}, {pipeline_mode = #tpu.pipeline_mode<synchronous>, transform_indices = @transform_1, window_bounds = array<i64: 32, 2>}, {pipeline_mode = #tpu.pipeline_mode<synchronous>, transform_indices = @transform_2, window_bounds = array<i64: 1, 2>}, {pipeline_mode = #tpu.pipeline_mode<synchronous>, transform_indices = @transform_3, window_bounds = array<i64: 32, 2>}, {pipeline_mode = #tpu.pipeline_mode<synchronous>, transform_indices = @transform_4, window_bounds = array<i64: 32, 1>}, {transform_indices = @transform_5, window_bounds = array<i64: 1, 32, 512>}]} {
    %c0 = arith.constant 0 : index
    %c0_0 = arith.constant 0 : index
    %c0_1 = arith.constant 0 : index
    %0 = vector.load %arg1[%c0, %c0_0, %c0_1] : memref<1x32x512xf32, #tpu.memory_space<vmem>>, vector<1x32x512xf32>
    %1 = vector.shape_cast %0 : vector<1x32x512xf32> to vector<32x512xf32>
    %cst = arith.constant dense<0.000000e+00> : vector<32xf32>
    %2 = vector.multi_reduction <add>, %1, %cst [1] : vector<32x512xf32> to vector<32xf32>
    %3 = vector.shape_cast %2 : vector<32xf32> to vector<32x1xf32>
    %cst_2 = arith.constant 0.001953125 : f32
    %4 = vector.broadcast %cst_2 : f32 to vector<32x1xf32>
    %5 = arith.mulf %3, %4 : vector<32x1xf32>
    %c0_3 = arith.constant 0 : index
    %c0_4 = arith.constant 0 : index
    %6 = vector.load %arg2[%c0_3, %c0_4] : memref<32x2xf32, #tpu.memory_space<vmem>>, vector<32x2xf32>
    %7 = vector.broadcast %5 : vector<32x1xf32> to vector<32x2xf32>
    %8 = arith.mulf %6, %7 : vector<32x2xf32>
    %cst_5 = arith.constant dense<0.000000e+00> : vector<2xf32>
    %9 = vector.multi_reduction <add>, %8, %cst_5 [0] : vector<32x2xf32> to vector<2xf32>
    %10 = vector.shape_cast %9 : vector<2xf32> to vector<1x2xf32>
    %c0_6 = arith.constant 0 : index
    %c0_7 = arith.constant 0 : index
    %11 = vector.load %arg3[%c0_6, %c0_7] : memref<1x2xf32, #tpu.memory_space<vmem>>, vector<1x2xf32>
    %12 = arith.addf %10, %11 : vector<1x2xf32>
    %13 = arith.negf %12 : vector<1x2xf32>
    %14 = math.exp %13 : vector<1x2xf32>
    %cst_8 = arith.constant 1.000000e+00 : f32
    %15 = vector.broadcast %cst_8 : f32 to vector<1x2xf32>
    %16 = arith.addf %15, %14 : vector<1x2xf32>
    %17 = arith.divf %15, %16 : vector<1x2xf32>
    %18 = arith.mulf %12, %17 : vector<1x2xf32>
    %c0_9 = arith.constant 0 : index
    %c0_10 = arith.constant 0 : index
    %19 = vector.load %arg4[%c0_9, %c0_10] : memref<32x2xf32, #tpu.memory_space<vmem>>, vector<32x2xf32>
    %20 = vector.broadcast %18 : vector<1x2xf32> to vector<32x2xf32>
    %21 = arith.mulf %19, %20 : vector<32x2xf32>
    %cst_11 = arith.constant dense<0.000000e+00> : vector<32xf32>
    %22 = vector.multi_reduction <add>, %21, %cst_11 [1] : vector<32x2xf32> to vector<32xf32>
    %23 = vector.shape_cast %22 : vector<32xf32> to vector<32x1xf32>
    %c0_12 = arith.constant 0 : index
    %c0_13 = arith.constant 0 : index
    %24 = vector.load %arg5[%c0_12, %c0_13] : memref<32x1xf32, #tpu.memory_space<vmem>>, vector<32x1xf32>
    %25 = arith.addf %23, %24 : vector<32x1xf32>
    %26 = arith.negf %25 : vector<32x1xf32>
    %27 = math.exp %26 : vector<32x1xf32>
    %cst_14 = arith.constant 1.000000e+00 : f32
    %28 = vector.broadcast %cst_14 : f32 to vector<32x1xf32>
    %29 = arith.addf %28, %27 : vector<32x1xf32>
    %30 = arith.divf %28, %29 : vector<32x1xf32>
    %31 = vector.broadcast %30 : vector<32x1xf32> to vector<32x512xf32>
    %32 = arith.mulf %1, %31 : vector<32x512xf32>
    %c0_15 = arith.constant 0 : index
    %c0_16 = arith.constant 0 : index
    %c0_17 = arith.constant 0 : index
    %33 = vector.load %arg6[%c0_15, %c0_16, %c0_17] : memref<1x32x512xf32, #tpu.memory_space<vmem>>, vector<1x32x512xf32>
    %34 = vector.shape_cast %33 : vector<1x32x512xf32> to vector<32x512xf32>
    %35 = vector.shape_cast %32 : vector<32x512xf32> to vector<1x32x512xf32>
    tpu.vector_store %arg6[%c0_15, %c0_16, %c0_17], %35 {strides = array<i32>} : memref<1x32x512xf32, #tpu.memory_space<vmem>>, vector<1x32x512xf32>,
    return
  }
  func.func @transform_0(%arg0: i32) -> (i32, i32, i32) {
    %c0_i32 = arith.constant 0 : i32
    %c0_i32_0 = arith.constant 0 : i32
    %c0_i32_1 = arith.constant 0 : i32
    return %arg0, %c0_i32, %c0_i32_0 : i32, i32, i32
  }
  func.func @transform_1(%arg0: i32) -> (i32, i32) {
    %c0_i32 = arith.constant 0 : i32
    %c0_i32_0 = arith.constant 0 : i32
    %c0_i32_1 = arith.constant 0 : i32
    return %c0_i32, %c0_i32_0 : i32, i32
  }
  func.func @transform_2(%arg0: i32) -> (i32, i32) {
    %c0_i32 = arith.constant 0 : i32
    %c0_i32_0 = arith.constant 0 : i32
    %c0_i32_1 = arith.constant 0 : i32
    return %c0_i32, %c0_i32_0 : i32, i32
  }
  func.func @transform_3(%arg0: i32) -> (i32, i32) {
    %c0_i32 = arith.constant 0 : i32
    %c0_i32_0 = arith.constant 0 : i32
    %c0_i32_1 = arith.constant 0 : i32
    return %c0_i32, %c0_i32_0 : i32, i32
  }
  func.func @transform_4(%arg0: i32) -> (i32, i32) {
    %c0_i32 = arith.constant 0 : i32
    %c0_i32_0 = arith.constant 0 : i32
    %c0_i32_1 = arith.constant 0 : i32
    return %c0_i32, %c0_i32_0 : i32, i32
  }
  func.func @transform_5(%arg0: i32) -> (i32, i32, i32) {
    %c0_i32 = arith.constant 0 : i32
    %c0_i32_0 = arith.constant 0 : i32
    %c0_i32_1 = arith.constant 0 : i32
    return %arg0, %c0_i32, %c0_i32_0 : i32, i32, i32
  }
}

</mosaic_0001>

<bundles_post_ra>
// kernel: tpu_custom_call.1
= control target key start
LH: loop header
LB: loop body
LE: loop exit
PB: predicated region body
PF: predicated region fallthrough
CT: control target
= control target key end

     0   :  { %10 = vsyncpa [#allocation3], 0  ;;  %s1064_s0 = inlined_call_operand.hbm [shape: f32[2,32,512], index: 0, kind: input, shape index: {}]   ;;  %s1065_s1 = inlined_call_operand.vmem [shape: f32[32,2], index: 1, kind: input, shape index: {}]   ;;  %s1066_s2 = inlined_call_operand.vmem [shape: f32[1,2], index: 2, kind: input, shape index: {}]   ;;  %s1067_s3 = inlined_call_operand.vmem [shape: f32[32,2], index: 3, kind: input, shape index: {}]   ;;  %s1068_s4 = inlined_call_operand.vmem [shape: f32[32,1], index: 4, kind: input, shape index: {}]   ;;  %s1069_s5 = inlined_call_operand.hbm [shape: f32[2,32,512], index: 5, kind: output, shape index: {}]  }
   0x1   :  { %12 = vsyncpa [#allocation3 + $0x1], 0 }
   0x2   :  { %13 = vsyncpa [#allocation4], 0 }
   0x3   :  { %15 = vsyncpa [#allocation4 + $0x1], 0  ;;  %s803_s18 = smov 0   ;;  %s805_s19 = smov 0  }
   0x4   :  { %s807_s20 = smov 0   ;;  %s809_s21 = smov 0  }
   0x5 LB: > { %s824_s22 = sadd.s32 4294967295, %s766_s21   ;;  %s575_s23 = sadd.s32 4294967294, %s766_s21   ;;  %s766_s21 = sphi %s809_s21, %s1079_s21   ;;  %s762_s20 = sphi %s807_s20, %s1078_s20   ;;  %s758_s19 = sphi %s805_s19, %s1077_s19   ;;  %s754_s18 = sphi %s803_s18, %s1076_s18  }
   0x6   : > { %s828_s24 = sadd.s32 1, %s766_s21   ;;  %s28_s25 = sadd.s32 1, %s762_s20 }
   0x7   : > { %s25_s26 = ssub.s32 %s766_s21, %s828_s24  ;;  %p35_p0 = scmp.ne.s32.totalorder %s762_s20, %s758_s19 }
   0x8   : > { %p26_p1 = scmp.eq.s32.totalorder %s25_s26, 0  ;;  %p36_p2 = scmp.eq.s32.totalorder %s766_s21, 0 }
   0x9   : > { %p41_p3 = scmp.ne.s32.totalorder %s758_s19, %s754_s18  ;;  %p42_p4 = scmp.eq.s32.totalorder %s824_s22, 0 }
   0xa   : > { %s840_s27 = scalar_select %p26_p1, %s762_s20, %s28_s25  }
   0xb   : > { %p842_p5 = por %p36_p2, %p35_p0  ;;  %p846_p6 = por %p42_p4, %p41_p3 }
   0xc   : > { %p149_p7 = scmp.eq.s32.totalorder %s824_s22, 1  ;;  %p155_p8 = scmp.eq.s32.totalorder %s575_s23, 1 }
   0xd   : > { %p608_p10 = scmp.lt.s32.totalorder %s766_s21, 2  ;;  %s187_s7 = sand.u32 1, %s762_s20  }
   0xe   : > { %p853_p11 = por %p149_p7, %p35_p0  ;;  %p857_p12 = por %p155_p8, %p41_p3 }
   0xf   : > { %s594_s8 = sshll.u32 %s766_s21, 7  ;;  %s578_s9 = sshll.u32 %s187_s7, 7 }
  0x10   : > { %s196_s12 = scalar_lea.hbm %s1064_s0, %s594_s8  ;;  %s191_s14 = scalar_lea.vmem [#allocation2], %s578_s9 }
  0x11   : > { %s197_s13 = sshll.u32 %s196_s12, 4  ;;  %s199_s15 = sshll.u32 %s191_s14, 4  ;;  %s198_s13 = int_to_ptr.hbm [resolvable:$true] %s197_s13  ;;  %s200_s15 = int_to_ptr.vmem [resolvable:$true] %s199_s15 }
  0x12   : > { %p868_p13 = pnand %p608_p10, %p842_p5  ;;  %p581_p0 = scmp.ge.s32.totalorder %s766_s21, 1 }
  0x13   : > { %p207_p1 = scmp.lt.s32.totalorder %s766_s21, 3  ;;  %s188_s17 = scalar_lea.sflag [#allocation3], %s187_s7 }
  0x14   : > { %s670_s23 = sshra.s32 %s198_s13, 4  ;;  %p674_p3 = pneg %p868_p13  ;;  %s671_s23 = int_to_ptr.hbm [resolvable:$true] %s670_s23 }
  0x15   : > { %s672_s25 = scalar_lea.hbm %s671_s23, 128  ;;  %s677_s28 = scalar_lea.hbm %s1064_s0, 256 }
  0x16   : > { %p673_p2 = scmp.ne.s32.totalorder %s671_s23, %s672_s25  ;;  %p678_p5 = scmp.lt.s32.totalorder %s671_s23, %s1064_s0 }
  0x17   : > { %p679_p8 = scmp.lt.s32.totalorder %s677_s28, %s672_s25 }
  0x18   : > { %p675_p4 = pnand %p674_p3, %p673_p2 }
  0x19   : > { %p680_p10 = por %p679_p8, %p678_p5 }
  0x1a   : > { %p676_p7 = pneg %p675_p4 }
  0x1c   : > { %p681_p9 = pnand %p680_p10, %p676_p7 }
  0x1e   : > { %684 = shalt.err (!%p681_p9)
}
  0x1f   : > { %s768_s7 = smov 512   ;;  %s769_s11 = smov 32  }
  0x20   : > { %603 = dma.hbm_to_vmem [thread:$0]  (!%p868_p13), %s198_s13, 2048, %s200_s15, %s188_s17, %s768_s7, %s768_s7, %s769_s11  }
  0x21   : > { %p208_p2 = pnand %p581_p0, %p207_p1 }
  0x22   : > { %s889_s12 = sand.u32 (!%p208_p2), 1, %s758_s19  }
  0x23   : > { %211 = sbr.rel (%p208_p2) target bundleno = 514 (0x202), region = 40  ;;  %s582_s14 = sshll.u32 (!%p208_p2), %s889_s12, 7 }
  0x24   : > { %s214_s23 = scalar_lea.sflag (!%p208_p2), [#allocation3], %s889_s12  ;;  %s217_s25 = scalar_lea.vmem (!%p208_p2), [#allocation2], %s582_s14 }
  0x28   : > { %745 = dma.done.wait (%p846_p6), %s214_s23, 2048  }
  0x29   : > { %747 = vsyncadd (%p846_p6), %s214_s23, 4294965248  ;;  %v899_v0 = vld [vmem:[%s217_s25] sm:$0xff]  ;;  %v901_v1 = vld [vmem:[%s217_s25 + $0x8] sm:$0xff]  ;;  %vm293_vm0 = vcmask 15360   ;;  %s1000_s23 = scalar_lea.vmem [#allocation5], %s582_s14  ;;  %s595_s14 = sshll.u32 %s824_s22, 7 }
  0x2a   : > { %v903_v2 = vld [vmem:[%s217_s25 + $0x10] sm:$0xff]  ;;  %v261_v3 = vadd.f32 %v901_v1, %v899_v0  ;;  %v907_v4 = vld [vmem:[%s217_s25 + $0x40] sm:$0xff]  ;;  %v909_v5 = vld [vmem:[%s217_s25 + $0x48] sm:$0xff]  ;;  %s498_s13 = scalar_lea.hbm %s1069_s5, %s595_s14  ;;  %s499_s15 = sshll.u32 %s1000_s23, 4  ;;  %s500_s15 = int_to_ptr.vmem [resolvable:$true] %s499_s15 }
  0x2b   : > { %v911_v6 = vld [vmem:[%s217_s25 + $0x18] sm:$0xff]  ;;  %v913_v7 = vld [vmem:[%s217_s25 + $0x50] sm:$0xff]  ;;  %v271_v8 = vadd.f32 %v909_v5, %v907_v4  ;;  %v917_v9 = vld [vmem:[%s217_s25 + $0x20] sm:$0xff]  ;;  %s501_s16 = sshll.u32 %s498_s13, 4  ;;  %s487_s22 = scalar_lea.sflag [#allocation4], %s889_s12  ;;  %s502_s16 = int_to_ptr.hbm [resolvable:$true] %s501_s16 }
  0x2c   : > { %v262_v10 = vadd.f32 %v261_v3, %v903_v2  ;;  %v920_v11 = vld [vmem:[%s217_s25 + $0x58] sm:$0xff]  ;;  %v922_v12 = vld [vmem:[%s217_s25 + $0x28] sm:$0xff]  ;;  %v925_v14 = vld [vmem:[%s217_s25 + $0x30] sm:$0xff]  ;;  %s714_s17 = sshra.s32 %s502_s16, 4  ;;  %s720_s9 = scalar_lea.hbm %s1069_s5, 256  ;;  %s715_s17 = int_to_ptr.hbm [resolvable:$true] %s714_s17 }
  0x2d   : > { %v272_v13 = vadd.f32 %v271_v8, %v913_v7  ;;  %v266_v15 = vadd.f32 %v922_v12, %v917_v9  ;;  %v929_v16 = vld [vmem:[%s217_s25 + $0x60] sm:$0xff]  ;;  %v931_v17 = vld [vmem:[%s217_s25 + $0x68] sm:$0xff]  ;;  %v934_v19 = vld [vmem:[%s217_s25 + $0x70] sm:$0xff]  ;;  %s716_s26 = scalar_lea.hbm %s715_s17, 128  ;;  %p721_p0 = scmp.lt.s32.totalorder %s715_s17, %s1069_s5 }
  0x2e   : > { %v263_v18 = vadd.f32 %v262_v10, %v911_v6  ;;  %v276_v20 = vadd.f32 %v931_v17, %v929_v16  ;;  %v940_v23 = vld [vmem:[%s217_s25 + $0x38] sm:$0xff]  ;;  %v285_v31 = vld [vmem:[%s1065_s1] sm:$0xff]  ;;  %v287_v33 = vld [vmem:[%s1065_s1 + $0x10] sm:$0xff]  ;;  %p717_p6 = scmp.ne.s32.totalorder %s715_s17, %s716_s26  ;;  %p722_p1 = scmp.lt.s32.totalorder %s720_s9, %s716_s26 }
  0x2f   : > { %v273_v21 = vadd.f32 %v272_v13, %v920_v11  ;;  %v267_v22 = vadd.f32 %v266_v15, %v925_v14  ;;  %v943_v25 = vld [vmem:[%s217_s25 + $0x78] sm:$0xff]  ;;  %v286_v34 = vld [vmem:[%s1065_s1 + $0x8] sm:$0xff]  ;;  %v307_v56 = vld [vmem:[%s1066_s2] sm:$0x1] }
  0x30   : > { %264 = vadd.xlane.f32.xlu0 %v263_v18  ;;  %v277_v24 = vadd.f32 %v276_v20, %v934_v19  ;;  %v288_v38 = vld [vmem:[%s1065_s1 + $0x18] sm:$0xff]  ;;  %p718_p9 = pnand %p717_p6, %p853_p11  ;;  %p723_p3 = por %p722_p1, %p721_p0 }
  0x31   : > { %274 = vadd.xlane.f32.xlu1 %v273_v21  ;;  %v268_v26 = vadd.f32 %v267_v22, %v940_v23 }
  0x32   : > { %v278_v27 = vadd.f32 %v277_v24, %v943_v25  ;;  %v332_v24 = vld [vmem:[%s1067_s3 + $0x18] sm:$0xff]  ;;  %p719_p13 = pneg %p718_p9 }
  0x34   : > { %p724_p4 = pnand %p723_p3, %p719_p13 }
  0x38   : > { %269 = vadd.xlane.f32.xlu0 %v268_v26  ;;  %v331_v26 = vld [vmem:[%s1067_s3 + $0x10] sm:$0xff] }
  0x39   : > { %279 = vadd.xlane.f32.xlu1 %v278_v27  ;;  %v329_v27 = vld [vmem:[%s1067_s3] sm:$0xff] }
  0xa3   : > { %v265_v28 = vpop.xlane.xlu0 %264 }
  0xa4   : > { %v275_v29 = vpop.xlane.xlu1 %274  ;;  %v281_v30 = vmul.f32 0.001953125, %v265_v28 }
  0xa5   : > { %v283_v32 = vmul.f32 0.001953125, %v275_v29 }
  0xa6   : > { %v289_v36 = vmul.f32 %v285_v31, %v281_v30 }
  0xa7   : > { %v291_v41 = vmul.f32 %v287_v33, %v283_v32 }
  0xa8   : > { %v294_v44 = vsel %vm293_vm0, %v289_v36, 0.0 }
  0xa9   : > { %v297_v47 = vsel %vm293_vm0, %v291_v41, 0.0  ;;  %v350_v41 = vld [vmem:[%s1068_s4] sm:$0xff] }
  0xab   : > { %v270_v35 = vpop.xlane.xlu0 %269 }
  0xac   : > { %v282_v37 = vmul.f32 0.001953125, %v270_v35  ;;  %v280_v39 = vpop.xlane.xlu1 %279  ;;  %v330_v35 = vld [vmem:[%s1067_s3 + $0x8] sm:$0xff] }
  0xad   : > { %v284_v40 = vmul.f32 0.001953125, %v280_v39  ;;  %v353_v39 = vld [vmem:[%s1068_s4 + $0x18] sm:$0xff] }
  0xae   : > { %v290_v42 = vmul.f32 %v286_v34, %v282_v37 }
  0xaf   : > { %v292_v43 = vmul.f32 %v288_v38, %v284_v40  ;;  %v770_v38 = vmov 0   ;;  %v352_v40 = vld [vmem:[%s1068_s4 + $0x10] sm:$0xff] }
  0xb0   : > { %v295_v45 = vsel %vm293_vm0, %v290_v42, 0.0  ;;  %649 = vset.pattern.permute.xlu1 %v770_v38  ;;  %647 = vset.pattern.permute.xlu2 %v770_v38 }
  0xb1   : > { %v296_v46 = vadd.f32 %v295_v45, %v294_v44  ;;  %v299_v48 = vsel %vm293_vm0, %v292_v43, 0.0  ;;  %648 = vset.pattern.permute.xlu0 %v770_v38 }
  0xb3   : > { %v298_v49 = vadd.f32 %v297_v47, %v296_v46 }
  0xb5   : > { %v300_v50 = vadd.f32 %v299_v48, %v298_v49 }
  0xb7   : > { %v301_v51 = vrot.slane %v300_v50, 4 }
  0xb9   : > { %v302_v52 = vadd.f32 %v301_v51, %v300_v50  ;;  %v351_v51 = vld [vmem:[%s1068_s4 + $0x8] sm:$0xff] }
  0xbb   : > { %v303_v53 = vrot.slane %v302_v52, 2 }
  0xbd   : > { %v304_v54 = vadd.f32 %v303_v53, %v302_v52 }
  0xbf   : > { %v305_v55 = vrot.slane %v304_v54, 1 }
  0xc1   : > { %v306_v57 = vadd.f32 %v305_v55, %v304_v54 }
  0xc3   : > { %v308_v58 = vadd.f32 %v307_v56, %v306_v57 }
  0xc5   : > { %v584_v59 = vmul.f32 -1.442695, %v308_v58 }
  0xc7   : > { %650 = vpow2.f32 %v584_v59 }
  0xcd   : > { %v651_v60 = vpop.eup %650 }
  0xce   : > { %v312_v61 = vadd.f32 1.0, %v651_v60 }
  0xd0   : > { %652 = vrcp.f32 %v312_v61  ;;  %v324_v8 = vand.u32 2147483648, %v312_v61  ;;  %v322_v13 = vand.u32 2147483647, %v312_v61  ;;  %vm318_vm2 = vweird.f32 %v312_v61 }
  0xd2   : > { %v325_v18 = vor.u32 1.1754944e-38, %v324_v8  ;;  %vm323_vm4 = vcmp.eq.f32.partialorder %v322_v13, 8.507059e+37 }
  0xd6   : > { %v653_v62 = vpop.eup %652 }
  0xd7   : > { %v314_v63 = vmul.f32 %v653_v62, %v312_v61  ;;  %vm319_vm1 = vweird.f32 %v653_v62 }
  0xd8   : > { %vm320_vm3 = vmor %vm318_vm2, %vm319_vm1 }
  0xd9   : > { %v315_v3 = vsub.f32 1.0, %v314_v63 }
  0xdb   : > { %v316_v10 = vmul.f32 %v653_v62, %v315_v3 }
  0xdd   : > { %v317_v15 = vadd.f32 %v653_v62, %v316_v10 }
  0xdf   : > { %v321_v20 = vsel %vm320_vm3, %v653_v62, %v317_v15 }
  0xe0   : > { %v326_v21 = vsel %vm323_vm4, %v325_v18, %v321_v20 }
  0xe1   : > { %v328_v22 = vmul.f32 %v326_v21, %v308_v58 }
  0xe3   : > { %v333_v28 = vperm.slane %v328_v22, 0 }
  0xe5   : > { %v337_v29 = vmul.f32 %v333_v28, %v332_v24  ;;  %v336_v30 = vmul.f32 %v333_v28, %v331_v26  ;;  %v334_v31 = vmul.f32 %v333_v28, %v329_v27  ;;  %v335_v36 = vmul.f32 %v333_v28, %v330_v35 }
  0xe7   : > { %v347_v32 = vsel %vm293_vm0, %v337_v29, 0.0  ;;  %v344_v33 = vsel %vm293_vm0, %v336_v30, 0.0  ;;  %v338_v34 = vsel %vm293_vm0, %v334_v31, 0.0  ;;  %v341_v37 = vsel %vm293_vm0, %v335_v36, 0.0 }
  0xe8   : > { %348 = vadd.xlane.f32.xlu1 %v347_v32  ;;  %345 = vadd.xlane.f32.xlu0 %v344_v33 }
  0xe9   : > { %339 = vadd.xlane.f32.xlu2 %v338_v34 }
  0xf1   : > { %342 = vadd.xlane.f32.xlu2 %v341_v37 }
 0x15b   : > { %v349_v42 = vpop.xlane.xlu1 %348  ;;  %v346_v43 = vpop.xlane.xlu0 %345 }
 0x15c   : > { %v357_v44 = vadd.f32 %v353_v39, %v349_v42  ;;  %v356_v45 = vadd.f32 %v352_v40, %v346_v43  ;;  %v340_v46 = vpop.xlane.xlu2 %339 }
 0x15d   : > { %v354_v47 = vadd.f32 %v350_v41, %v340_v46 }
 0x15e   : > { %v588_v48 = vmul.f32 -1.442695, %v357_v44  ;;  %v587_v49 = vmul.f32 -1.442695, %v356_v45 }
 0x15f   : > { %v585_v50 = vmul.f32 -1.442695, %v354_v47 }
 0x160   : > { %654 = vpow2.f32 %v588_v48 }
 0x161   : > { %656 = vpow2.f32 %v587_v49 }
 0x162   : > { %658 = vpow2.f32 %v585_v50 }
 0x164   : > { %v343_v52 = vpop.xlane.xlu2 %342 }
 0x165   : > { %v355_v53 = vadd.f32 %v351_v51, %v343_v52 }
 0x166   : > { %v655_v54 = vpop.eup %654 }
 0x167   : > { %v657_v55 = vpop.eup %656  ;;  %v373_v56 = vadd.f32 1.0, %v655_v54  ;;  %v586_v59 = vmul.f32 -1.442695, %v355_v53 }
 0x168   : > { %v659_v57 = vpop.eup %658  ;;  %v372_v58 = vadd.f32 1.0, %v657_v55 }
 0x169   : > { %660 = vrcp.f32 %v373_v56  ;;  %v370_v60 = vadd.f32 1.0, %v659_v57  ;;  %v430_v42 = vand.u32 2147483648, %v373_v56  ;;  %vm424_vm14 = vweird.f32 %v373_v56 }
 0x16a   : > { %662 = vrcp.f32 %v372_v58  ;;  %v413_v20 = vand.u32 2147483647, %v372_v58  ;;  %v415_v21 = vand.u32 2147483648, %v372_v58  ;;  %vm409_vm7 = vweird.f32 %v372_v58 }
 0x16b   : > { %664 = vrcp.f32 %v370_v60  ;;  %v385_v27 = vand.u32 2147483648, %v370_v60  ;;  %v383_v29 = vand.u32 2147483647, %v370_v60  ;;  %vm379_vm9 = vweird.f32 %v370_v60 }
 0x16c   : > { %666 = vpow2.f32 %v586_v59  ;;  %v416_v31 = vor.u32 1.1754944e-38, %v415_v21  ;;  %vm414_vm10 = vcmp.eq.f32.partialorder %v413_v20, 8.507059e+37  ;;  %v428_v43 = vand.u32 2147483647, %v373_v56 }
 0x16d   : > { %v386_v35 = vor.u32 1.1754944e-38, %v385_v27  ;;  %vm384_vm12 = vcmp.eq.f32.partialorder %v383_v29, 8.507059e+37  ;;  %v431_v49 = vor.u32 1.1754944e-38, %v430_v42 }
 0x16e   : > { %vm429_vm1 = vcmp.eq.f32.partialorder %v428_v43, 8.507059e+37 }
 0x16f   : > { %v661_v61 = vpop.eup %660 }
 0x170   : > { %v663_v62 = vpop.eup %662  ;;  %v420_v63 = vmul.f32 %v661_v61, %v373_v56  ;;  %vm425_vm13 = vweird.f32 %v661_v61 }
 0x171   : > { %v665_v3 = vpop.eup %664  ;;  %v405_v8 = vmul.f32 %v663_v62, %v372_v58  ;;  %vm410_vm5 = vweird.f32 %v663_v62  ;;  %vm426_vm15 = vmor %vm424_vm14, %vm425_vm13 }
 0x172   : > { %v667_v10 = vpop.eup %666  ;;  %v375_v13 = vmul.f32 %v665_v3, %v370_v60  ;;  %v421_v24 = vsub.f32 1.0, %v420_v63  ;;  %vm380_vm6 = vweird.f32 %v665_v3  ;;  %vm411_vm8 = vmor %vm409_vm7, %vm410_vm5 }
 0x173   : > { %v371_v15 = vadd.f32 1.0, %v667_v10  ;;  %v406_v18 = vsub.f32 1.0, %v405_v8  ;;  %vm381_vm11 = vmor %vm379_vm9, %vm380_vm6 }
 0x174   : > { %v376_v22 = vsub.f32 1.0, %v375_v13  ;;  %v422_v33 = vmul.f32 %v661_v61, %v421_v24 }
 0x175   : > { %668 = vrcp.f32 %v371_v15  ;;  %v407_v26 = vmul.f32 %v663_v62, %v406_v18  ;;  %v400_v45 = vand.u32 2147483648, %v371_v15  ;;  %v398_v48 = vand.u32 2147483647, %v371_v15 }
 0x176   : > { %v377_v28 = vmul.f32 %v665_v3, %v376_v22  ;;  %v423_v40 = vadd.f32 %v661_v61, %v422_v33  ;;  %vm394_vm2 = vweird.f32 %v371_v15 }
 0x177   : > { %v408_v30 = vadd.f32 %v663_v62, %v407_v26  ;;  %v401_v52 = vor.u32 1.1754944e-38, %v400_v45  ;;  %vm399_vm4 = vcmp.eq.f32.partialorder %v398_v48, 8.507059e+37 }
 0x178   : > { %v378_v32 = vadd.f32 %v665_v3, %v377_v28  ;;  %v427_v46 = vsel %vm426_vm15, %v661_v61, %v423_v40 }
 0x179   : > { %v412_v34 = vsel %vm411_vm8, %v663_v62, %v408_v30  ;;  %v432_v51 = vsel %vm429_vm1, %v431_v49, %v427_v46 }
 0x17a   : > { %v417_v36 = vsel %vm414_vm10, %v416_v31, %v412_v34  ;;  %v382_v37 = vsel %vm381_vm11, %v665_v3, %v378_v32 }
 0x17b   : > { %v669_v38 = vpop.eup %668  ;;  %446 = vperm.xlu1 %649, %v417_v36   ;;  %v387_v39 = vsel %vm384_vm12, %v386_v35, %v382_v37 }
 0x17c   : > { %436 = vperm.xlu2 %647, %v387_v39   ;;  %v390_v41 = vmul.f32 %v669_v38, %v371_v15  ;;  %vm395_vm0 = vweird.f32 %v669_v38 }
 0x17d   : > { %vm396_vm3 = vmor %vm394_vm2, %vm395_vm0 }
 0x17e   : > { %v391_v44 = vsub.f32 1.0, %v390_v41 }
 0x180   : > { %v392_v47 = vmul.f32 %v669_v38, %v391_v44 }
 0x182   : > { %v393_v50 = vadd.f32 %v669_v38, %v392_v47 }
 0x184   : > { %451 = vperm.xlu2 %647, %v432_v51   ;;  %v397_v53 = vsel %vm396_vm3, %v669_v38, %v393_v50 }
 0x185   : > { %v402_v54 = vsel %vm399_vm4, %v401_v52, %v397_v53 }
 0x186   : > { %441 = vperm.xlu0 %648, %v402_v54  }
 0x1d6   : > { %v437_v55 = vpop.permute.xlu2 %436 }
 0x1d7   : > { %v454_v56 = vmul.f32 %v437_v55, %v899_v0  ;;  %v455_v57 = vmul.f32 %v437_v55, %v901_v1  ;;  %v456_v58 = vmul.f32 %v437_v55, %v903_v2  ;;  %v457_v59 = vmul.f32 %v437_v55, %v911_v6 }
 0x1d9   : > { %470 = vst [vmem:[%s1000_s23] sm:$0xff] %v454_v56 }
 0x1da   : > { %471 = vst [vmem:[%s1000_s23 + $0x8] sm:$0xff] %v455_v57 }
 0x1db   : > { %472 = vst [vmem:[%s1000_s23 + $0x10] sm:$0xff] %v456_v58 }
 0x1dc   : > { %473 = vst [vmem:[%s1000_s23 + $0x18] sm:$0xff] %v457_v59 }
 0x1de   : > { %v452_v0 = vpop.permute.xlu2 %451 }
 0x1df   : > { %v466_v1 = vmul.f32 %v452_v0, %v929_v16  ;;  %v467_v2 = vmul.f32 %v452_v0, %v931_v17  ;;  %v468_v6 = vmul.f32 %v452_v0, %v934_v19  ;;  %v469_v60 = vmul.f32 %v452_v0, %v943_v25 }
 0x1e1   : > { %482 = vst [vmem:[%s1000_s23 + $0x60] sm:$0xff] %v466_v1 }
 0x1e2   : > { %483 = vst [vmem:[%s1000_s23 + $0x68] sm:$0xff] %v467_v2 }
 0x1e3   : > { %484 = vst [vmem:[%s1000_s23 + $0x70] sm:$0xff] %v468_v6 }
 0x1e4   : > { %485 = vst [vmem:[%s1000_s23 + $0x78] sm:$0xff] %v469_v60 }
 0x1ed   : > { %v447_v61 = vpop.permute.xlu1 %446 }
 0x1ee   : > { %v462_v62 = vmul.f32 %v447_v61, %v907_v4  ;;  %v463_v63 = vmul.f32 %v447_v61, %v909_v5  ;;  %v464_v16 = vmul.f32 %v447_v61, %v913_v7  ;;  %v465_v17 = vmul.f32 %v447_v61, %v920_v11 }
 0x1f0   : > { %478 = vst [vmem:[%s1000_s23 + $0x40] sm:$0xff] %v462_v62 }
 0x1f1   : > { %479 = vst [vmem:[%s1000_s23 + $0x48] sm:$0xff] %v463_v63 }
 0x1f2   : > { %480 = vst [vmem:[%s1000_s23 + $0x50] sm:$0xff] %v464_v16 }
 0x1f3   : > { %481 = vst [vmem:[%s1000_s23 + $0x58] sm:$0xff] %v465_v17 }
 0x1f8   : > { %v442_v4 = vpop.permute.xlu0 %441 }
 0x1f9   : > { %v458_v5 = vmul.f32 %v442_v4, %v917_v9  ;;  %v459_v7 = vmul.f32 %v442_v4, %v922_v12  ;;  %v460_v11 = vmul.f32 %v442_v4, %v925_v14  ;;  %v461_v19 = vmul.f32 %v442_v4, %v940_v23 }
 0x1fb   : > { %474 = vst [vmem:[%s1000_s23 + $0x20] sm:$0xff] %v458_v5 }
 0x1fc   : > { %475 = vst [vmem:[%s1000_s23 + $0x28] sm:$0xff] %v459_v7 }
 0x1fd   : > { %476 = vst [vmem:[%s1000_s23 + $0x30] sm:$0xff] %v460_v11 }
 0x1fe   : > { %477 = vst [vmem:[%s1000_s23 + $0x38] sm:$0xff] %v461_v19 }
 0x1ff   : > { %727 = shalt.err (!%p724_p4)
}
 0x200   : > { %s771_s12 = smov 512   ;;  %s772_s11 = smov 32  }
 0x201   : > { %598 = dma.vmem_to_hbm [thread:$0]  (%p853_p11), %s500_s15, 2048, %s502_s16, %s487_s22, %s771_s12, %s771_s12, %s772_s11  }
 0x202 PF: > { %s516_s23 = sand.u32 1, %s754_s18   ;;  %p1075_p7 = scmp.ge.s32.totalorder %s766_s21, 2 }
 0x203   : > { %s517_s14 = scalar_lea.sflag [#allocation4], %s516_s23 }
 0x204   : > { %p605_p5 = pnand %p1075_p7, %p857_p12 }
 0x206   : > { %p606_p8 = pneg %p605_p5 }
 0x208   : > { %749 = dma.done.wait (%p606_p8), %s517_s14, 2048  }
 0x209   : > { %751 = vsyncadd (%p606_p8), %s517_s14, 4294965248  ;;  %p18_p10 = scmp.ge.s32.totalorder %s828_s24, 4   ;;  %s1076_s18 = smov %s758_s19 }
 0x20a   : > { %s1077_s19 = smov %s762_s20  ;;  %s1078_s20 = smov %s840_s27 }
 0x20b   : > { %s1079_s21 = smov %s828_s24  ;;  %20 = sbr.rel (!%p18_p10) target bundleno = 5 (0x5), region = 85 }
 0x210   :  { %523 = vsyncpa [#allocation3], 1 }
 0x211   :  { %525 = vsyncpa [#allocation3 + $0x1], 1 }
 0x212   :  { %526 = vsyncpa [#allocation4], 1 }
 0x213   :  { %528 = vsyncpa [#allocation4 + $0x1], 1 }

</bundles_post_ra>
